<compile_context>
chip_gen: v5e
topology: v5e:2x2
jax: 0.10.0
libtpu: 0.0.40
codegen_flags: <defaults>
</compile_context>

<pallas_src>
import jax
import jax.numpy as jnp
from jax.experimental import pallas as pl
from jax.experimental.pallas import tpu as pltpu


def _bareg_kernel(x_ref,
                  w1_ref, b1_ref,
                  w2_ref, b2_ref,
                  w3_ref, b3_ref,
                  w4_ref, b4_ref,
                  o_ref):
    """Fused fc1->relu->fc2->relu->fc3->relu->fc4 on one batch tile."""
    # Operands stay in their native (possibly bf16) dtype; accumulate in f32.
    h = jnp.dot(x_ref[...], w1_ref[...], preferred_element_type=jnp.float32)
    h = jnp.maximum(h + b1_ref[...].astype(jnp.float32), 0.0)   # relu; dropout1 == id

    h = h.astype(w2_ref.dtype)
    h = jnp.dot(h, w2_ref[...], preferred_element_type=jnp.float32)
    h = jnp.maximum(h + b2_ref[...].astype(jnp.float32), 0.0)   # relu; dropout2 == id

    h = h.astype(w3_ref.dtype)
    h = jnp.dot(h, w3_ref[...], preferred_element_type=jnp.float32)
    h = jnp.maximum(h + b3_ref[...].astype(jnp.float32), 0.0)   # relu; dropout3 == id

    h = h.astype(w4_ref.dtype)
    out = jnp.dot(h, w4_ref[...], preferred_element_type=jnp.float32)
    out = out + b4_ref[...].astype(jnp.float32)
    o_ref[...] = out.astype(o_ref.dtype)


def _round_up(n, m):
    return ((n + m - 1) // m) * m


def _pad2(a, rows, cols):
    pr, pc = rows - a.shape[0], cols - a.shape[1]
    if pr or pc:
        a = jnp.pad(a, ((0, pr), (0, pc)))
    return a


def _vmem_cap_bytes():
    """Per-generation scoped-VMEM cap: 7/8 of physical capacity."""
    try:
        cap = int(pltpu.get_tpu_info().vmem_capacity_bytes)
    except Exception:
        cap = 64 << 20          # conservative fallback, valid on every generation
    return max(32 << 20, (cap * 7) // 8)


def prepare_params(params, *, compute_dtype=None):
    """One-time parameter prep (hoisted out of the forward hot path).

    Optionally casts weights to compute_dtype (e.g. bf16) and zero-pads every
    feature dim to a multiple of 128 so all matmuls / stores are lane-dense.
    Zero padding is exact: padded hidden lanes stay 0 through ReLU, padded
    output lanes are sliced off.  Biases stay f32 (added to the f32 acc).

    Returns (padded_param_tuple, (input_dim, hidden_dim, output_dim)).
    """
    w1, b1, w2, b2, w3, b3, w4, b4 = params
    input_dim, hidden_dim = int(w1.shape[0]), int(w1.shape[1])
    output_dim = int(w4.shape[1])

    if compute_dtype is not None:
        w1, w2, w3, w4 = (w.astype(compute_dtype) for w in (w1, w2, w3, w4))

    di = _round_up(input_dim, 128)
    dh = _round_up(hidden_dim, 128)
    do = _round_up(output_dim, 128)

    padded = (
        _pad2(w1, di, dh), _pad2(b1, 1, dh),
        _pad2(w2, dh, dh), _pad2(b2, 1, dh),
        _pad2(w3, dh, dh), _pad2(b3, 1, dh),
        _pad2(w4, dh, do), _pad2(b4, 1, do),
    )
    return padded, (input_dim, hidden_dim, output_dim)


def bareg_forward(x, prepared, *, block_b=None, compute_dtype=None, out_dtype=None):
    """Run the fused BAReg MLP.

    x: [B, input_dim].  prepared: output of prepare_params(params, ...).
    block_b: batch tile; default is generation-aware (512 on v5e/v6e, 256 on
             v7x), clamped so large batches keep >=2 grid steps.
    compute_dtype: dtype x is cast to for the matmuls (weights must have been
             prepared with the same compute_dtype); accumulation is f32.
    out_dtype: output dtype; defaults to compute_dtype (or x.dtype).
    """
    padded, (input_dim, hidden_dim, output_dim) = prepared
    w1p, b1p, w2p, b2p, w3p, b3p, w4p, b4p = padded
    B, xd = x.shape
    assert xd == input_dim, "x feature dim does not match prepared params"
    di, dh = w1p.shape
    do = w4p.shape[1]

    if compute_dtype is not None:
        x = x.astype(compute_dtype)
    if out_dtype is None:
        out_dtype = compute_dtype if compute_dtype is not None else x.dtype
    out_dtype = jnp.dtype(out_dtype)

    vmem_cap = _vmem_cap_bytes()

    # Sublane granularity for the streamed arrays: 8 rows (f32), 16 (bf16),
    # 32 (8-bit) so batch tiles are layout-native for the I/O dtypes.
    sub = 8
    for dt in (x.dtype, out_dtype):
        sub = max(sub, 32 // jnp.dtype(dt).itemsize)

    b_ceil = _round_up(B, sub)
    if block_b is None:
        block_b = 512 if vmem_cap >= (96 << 20) else 256   # v5e/v6e vs v7x
    block_b = min(_round_up(block_b, sub), b_ceil)
    if b_ceil >= 256:
        # Keep >=2 grid steps for big batches: both v7x TensorCores get work
        # and the x/out DMA double-buffering stays alive.
        block_b = min(block_b, max(128, _round_up(pl.cdiv(B, 2), sub)))
    block_b = max(sub, block_b)

    # Only materialize a padded copy of x if its feature dim is not already a
    # 128-multiple; ragged batch is handled by the grid (masked edge block).
    x_p = _pad2(x, B, di) if di != input_dim else x

    # VMEM budget: single-buffered resident weights/biases (Buffered(1)) +
    # double-buffered x/out tiles + f32 activations, capped per generation.
    w_item = jnp.dtype(w1p.dtype).itemsize
    x_item = jnp.dtype(x_p.dtype).itemsize
    o_item = out_dtype.itemsize
    weight_bytes = (di * dh + 2 * dh * dh + dh * do) * w_item
    bias_bytes = (3 * dh + do) * jnp.dtype(b1p.dtype).itemsize
    io_bytes = 2 * block_b * (di * x_item + do * o_item)
    act_bytes = 3 * block_b * dh * 4
    est = weight_bytes + bias_bytes + io_bytes + act_bytes
    vmem_limit = int(min(max(est + (8 << 20), 32 << 20), vmem_cap))

    def resident_spec(shape):
        # Grid-invariant block: stays resident, single-buffered (never changes).
        return pl.BlockSpec(shape, lambda i: (0, 0), pipeline_mode=pl.Buffered(1))

    grid = (pl.cdiv(B, block_b),)

    flops = 2 * B * (di * dh + 2 * dh * dh + dh * do)
    bytes_accessed = (B * di * x_item + weight_bytes + bias_bytes
                      + B * do * o_item)
    cost = pl.CostEstimate(flops=flops, transcendentals=0,
                           bytes_accessed=bytes_accessed)

    out_p = pl.pallas_call(
        _bareg_kernel,
        out_shape=jax.ShapeDtypeStruct((B, do), out_dtype),
        grid_spec=pltpu.PrefetchScalarGridSpec(
            num_scalar_prefetch=0,
            grid=grid,
            in_specs=[
                pl.BlockSpec((block_b, di), lambda i: (i, 0)),   # x tile (streamed)
                resident_spec((di, dh)),                         # w1
                resident_spec((1, dh)),                          # b1
                resident_spec((dh, dh)),                         # w2
                resident_spec((1, dh)),                          # b2
                resident_spec((dh, dh)),                         # w3
                resident_spec((1, dh)),                          # b3
                resident_spec((dh, do)),                         # w4
                resident_spec((1, do)),                          # b4
            ],
            out_specs=pl.BlockSpec((block_b, do), lambda i: (i, 0)),
        ),
        compiler_params=pltpu.CompilerParams(
            dimension_semantics=("parallel",),
            vmem_limit_bytes=vmem_limit,
        ),
        cost_estimate=cost,
    )(x_p, w1p, b1p, w2p, b2p, w3p, b3p, w4p, b4p)

    return out_p if do == output_dim else out_p[:, :output_dim]


def init_params(key, input_dim, hidden_dim, output_dim, dtype=jnp.float32):
    """PyTorch-Linear-style uniform init; weights stored [in, out]."""
    ks = jax.random.split(key, 8)

    def linear(kw, kb, fan_in, fan_out):
        bound = 1.0 / jnp.sqrt(jnp.asarray(fan_in, dtype=jnp.float32))
        w = jax.random.uniform(kw, (fan_in, fan_out), dtype, -bound, bound)
        b = jax.random.uniform(kb, (1, fan_out), dtype, -bound, bound)
        return w, b

    w1, b1 = linear(ks[0], ks[1], input_dim, hidden_dim)
    w2, b2 = linear(ks[2], ks[3], hidden_dim, hidden_dim)
    w3, b3 = linear(ks[4], ks[5], hidden_dim, hidden_dim)
    w4, b4 = linear(ks[6], ks[7], hidden_dim, output_dim)
    return (w1, b1, w2, b2, w3, b3, w4, b4)


def bareg_reference(x, params):
    """Plain-JAX reference (dropout in eval mode == identity)."""
    w1, b1, w2, b2, w3, b3, w4, b4 = params
    h = jnp.maximum(x @ w1 + b1, 0.0)
    h = jnp.maximum(h @ w2 + b2, 0.0)
    h = jnp.maximum(h @ w3 + b3, 0.0)
    return h @ w4 + b4


if __name__ == "__main__":
    key = jax.random.PRNGKey(0)
    k_x, k_p = jax.random.split(key)

    B, input_dim, hidden_dim, output_dim = 16, 24, 48, 8
    x = jax.random.normal(k_x, (B, input_dim), dtype=jnp.float32)
    params = init_params(k_p, input_dim, hidden_dim, output_dim)

    ref = bareg_reference(x, params)

    # f32 path: one-time param prep; block_b=8 -> 2 grid steps even at tiny B.
    prep_f32 = prepare_params(params)
    out_f32 = jax.block_until_ready(bareg_forward(x, prep_f32, block_b=8))
    assert out_f32.shape == (B, output_dim)
    assert out_f32.dtype == jnp.float32
    assert jnp.allclose(out_f32, ref, atol=1e-5, rtol=1e-5), "f32 mismatch vs reference"

    # bf16 fast path: MXU-native operands, f32 accumulation, bf16 output.
    # NOTE: activations are re-quantized to bf16 between layers and the output
    # is bf16, so error vs. the f32 reference compounds -> loose tolerance.
    prep_bf16 = prepare_params(params, compute_dtype=jnp.bfloat16)
    out_bf16 = jax.block_until_ready(
        bareg_forward(x, prep_bf16, block_b=8, compute_dtype=jnp.bfloat16))
    assert out_bf16.shape == (B, output_dim)
    assert out_bf16.dtype == jnp.bfloat16
    assert jnp.allclose(out_bf16.astype(jnp.float32), ref, atol=5e-2, rtol=5e-2), \
        "bf16 mismatch vs reference"

    print("KERNEL_OK")
</pallas_src>

<mosaic_0001>
module attributes {stable_mosaic.version = 11 : i64} {
  func.func @_bareg_kernel(%arg0: i32, %arg1: memref<8x128xf32, #tpu.memory_space<vmem>>, %arg2: memref<128x128xf32, #tpu.memory_space<vmem>>, %arg3: memref<1x128xf32, #tpu.memory_space<vmem>>, %arg4: memref<128x128xf32, #tpu.memory_space<vmem>>, %arg5: memref<1x128xf32, #tpu.memory_space<vmem>>, %arg6: memref<128x128xf32, #tpu.memory_space<vmem>>, %arg7: memref<1x128xf32, #tpu.memory_space<vmem>>, %arg8: memref<128x128xf32, #tpu.memory_space<vmem>>, %arg9: memref<1x128xf32, #tpu.memory_space<vmem>>, %arg10: memref<8x128xf32, #tpu.memory_space<vmem>>) attributes {dimension_semantics = [#tpu.dimension_semantics<parallel>], iteration_bounds = array<i64: 2>, scalar_prefetch = 0 : i64, scratch_operands = 0 : i64, tpu.core_type = #tpu.core_type<tc>, window_params = [{transform_indices = @transform_0, window_bounds = array<i64: 8, 128>}, {pipeline_mode = #tpu.pipeline_mode<synchronous>, transform_indices = @transform_1, window_bounds = array<i64: 128, 128>}, {pipeline_mode = #tpu.pipeline_mode<synchronous>, transform_indices = @transform_2, window_bounds = array<i64: 1, 128>}, {pipeline_mode = #tpu.pipeline_mode<synchronous>, transform_indices = @transform_3, window_bounds = array<i64: 128, 128>}, {pipeline_mode = #tpu.pipeline_mode<synchronous>, transform_indices = @transform_4, window_bounds = array<i64: 1, 128>}, {pipeline_mode = #tpu.pipeline_mode<synchronous>, transform_indices = @transform_5, window_bounds = array<i64: 128, 128>}, {pipeline_mode = #tpu.pipeline_mode<synchronous>, transform_indices = @transform_6, window_bounds = array<i64: 1, 128>}, {pipeline_mode = #tpu.pipeline_mode<synchronous>, transform_indices = @transform_7, window_bounds = array<i64: 128, 128>}, {pipeline_mode = #tpu.pipeline_mode<synchronous>, transform_indices = @transform_8, window_bounds = array<i64: 1, 128>}, {transform_indices = @transform_9, window_bounds = array<i64: 8, 128>}]} {
    %c0 = arith.constant 0 : index
    %c0_0 = arith.constant 0 : index
    %0 = vector.load %arg1[%c0, %c0_0] : memref<8x128xf32, #tpu.memory_space<vmem>>, vector<8x128xf32>
    %c0_1 = arith.constant 0 : index
    %c0_2 = arith.constant 0 : index
    %1 = vector.load %arg2[%c0_1, %c0_2] : memref<128x128xf32, #tpu.memory_space<vmem>>, vector<128x128xf32>
    %cst = arith.constant dense<0.000000e+00> : vector<8x128xf32>
    %2 = tpu.matmul %0, %1, %cst {dimension_numbers = #tpu.dot_dimension_numbers<[1], [0], [0], [1], [0, 0, 1, 1], [], []>} : vector<8x128xf32>, vector<128x128xf32>, vector<8x128xf32> -> vector<8x128xf32>
    %c0_3 = arith.constant 0 : index
    %c0_4 = arith.constant 0 : index
    %3 = vector.load %arg3[%c0_3, %c0_4] : memref<1x128xf32, #tpu.memory_space<vmem>>, vector<1x128xf32>
    %4 = vector.broadcast %3 : vector<1x128xf32> to vector<8x128xf32>
    %5 = arith.addf %2, %4 : vector<8x128xf32>
    %cst_5 = arith.constant 0.000000e+00 : f32
    %6 = vector.broadcast %cst_5 : f32 to vector<8x128xf32>
    %7 = arith.maximumf %5, %6 : vector<8x128xf32>
    %c0_6 = arith.constant 0 : index
    %c0_7 = arith.constant 0 : index
    %8 = vector.load %arg4[%c0_6, %c0_7] : memref<128x128xf32, #tpu.memory_space<vmem>>, vector<128x128xf32>
    %cst_8 = arith.constant dense<0.000000e+00> : vector<8x128xf32>
    %9 = tpu.matmul %7, %8, %cst_8 {dimension_numbers = #tpu.dot_dimension_numbers<[1], [0], [0], [1], [0, 0, 1, 1], [], []>} : vector<8x128xf32>, vector<128x128xf32>, vector<8x128xf32> -> vector<8x128xf32>
    %c0_9 = arith.constant 0 : index
    %c0_10 = arith.constant 0 : index
    %10 = vector.load %arg5[%c0_9, %c0_10] : memref<1x128xf32, #tpu.memory_space<vmem>>, vector<1x128xf32>
    %11 = vector.broadcast %10 : vector<1x128xf32> to vector<8x128xf32>
    %12 = arith.addf %9, %11 : vector<8x128xf32>
    %cst_11 = arith.constant 0.000000e+00 : f32
    %13 = vector.broadcast %cst_11 : f32 to vector<8x128xf32>
    %14 = arith.maximumf %12, %13 : vector<8x128xf32>
    %c0_12 = arith.constant 0 : index
    %c0_13 = arith.constant 0 : index
    %15 = vector.load %arg6[%c0_12, %c0_13] : memref<128x128xf32, #tpu.memory_space<vmem>>, vector<128x128xf32>
    %cst_14 = arith.constant dense<0.000000e+00> : vector<8x128xf32>
    %16 = tpu.matmul %14, %15, %cst_14 {dimension_numbers = #tpu.dot_dimension_numbers<[1], [0], [0], [1], [0, 0, 1, 1], [], []>} : vector<8x128xf32>, vector<128x128xf32>, vector<8x128xf32> -> vector<8x128xf32>
    %c0_15 = arith.constant 0 : index
    %c0_16 = arith.constant 0 : index
    %17 = vector.load %arg7[%c0_15, %c0_16] : memref<1x128xf32, #tpu.memory_space<vmem>>, vector<1x128xf32>
    %18 = vector.broadcast %17 : vector<1x128xf32> to vector<8x128xf32>
    %19 = arith.addf %16, %18 : vector<8x128xf32>
    %cst_17 = arith.constant 0.000000e+00 : f32
    %20 = vector.broadcast %cst_17 : f32 to vector<8x128xf32>
    %21 = arith.maximumf %19, %20 : vector<8x128xf32>
    %c0_18 = arith.constant 0 : index
    %c0_19 = arith.constant 0 : index
    %22 = vector.load %arg8[%c0_18, %c0_19] : memref<128x128xf32, #tpu.memory_space<vmem>>, vector<128x128xf32>
    %cst_20 = arith.constant dense<0.000000e+00> : vector<8x128xf32>
    %23 = tpu.matmul %21, %22, %cst_20 {dimension_numbers = #tpu.dot_dimension_numbers<[1], [0], [0], [1], [0, 0, 1, 1], [], []>} : vector<8x128xf32>, vector<128x128xf32>, vector<8x128xf32> -> vector<8x128xf32>
    %c0_21 = arith.constant 0 : index
    %c0_22 = arith.constant 0 : index
    %24 = vector.load %arg9[%c0_21, %c0_22] : memref<1x128xf32, #tpu.memory_space<vmem>>, vector<1x128xf32>
    %25 = vector.broadcast %24 : vector<1x128xf32> to vector<8x128xf32>
    %26 = arith.addf %23, %25 : vector<8x128xf32>
    %c0_23 = arith.constant 0 : index
    %c0_24 = arith.constant 0 : index
    %27 = vector.load %arg10[%c0_23, %c0_24] : memref<8x128xf32, #tpu.memory_space<vmem>>, vector<8x128xf32>
    tpu.vector_store %arg10[%c0_23, %c0_24], %26 {strides = array<i32>} : memref<8x128xf32, #tpu.memory_space<vmem>>, vector<8x128xf32>,
    return
  }
  func.func @transform_0(%arg0: i32) -> (i32, i32) {
    %c0_i32 = arith.constant 0 : i32
    %c0_i32_0 = arith.constant 0 : i32
    return %arg0, %c0_i32 : i32, i32
  }
  func.func @transform_1(%arg0: i32) -> (i32, i32) {
    %c0_i32 = arith.constant 0 : i32
    %c0_i32_0 = arith.constant 0 : i32
    %c0_i32_1 = arith.constant 0 : i32
    return %c0_i32, %c0_i32_0 : i32, i32
  }
  func.func @transform_2(%arg0: i32) -> (i32, i32) {
    %c0_i32 = arith.constant 0 : i32
    %c0_i32_0 = arith.constant 0 : i32
    %c0_i32_1 = arith.constant 0 : i32
    return %c0_i32, %c0_i32_0 : i32, i32
  }
  func.func @transform_3(%arg0: i32) -> (i32, i32) {
    %c0_i32 = arith.constant 0 : i32
    %c0_i32_0 = arith.constant 0 : i32
    %c0_i32_1 = arith.constant 0 : i32
    return %c0_i32, %c0_i32_0 : i32, i32
  }
  func.func @transform_4(%arg0: i32) -> (i32, i32) {
    %c0_i32 = arith.constant 0 : i32
    %c0_i32_0 = arith.constant 0 : i32
    %c0_i32_1 = arith.constant 0 : i32
    return %c0_i32, %c0_i32_0 : i32, i32
  }
  func.func @transform_5(%arg0: i32) -> (i32, i32) {
    %c0_i32 = arith.constant 0 : i32
    %c0_i32_0 = arith.constant 0 : i32
    %c0_i32_1 = arith.constant 0 : i32
    return %c0_i32, %c0_i32_0 : i32, i32
  }
  func.func @transform_6(%arg0: i32) -> (i32, i32) {
    %c0_i32 = arith.constant 0 : i32
    %c0_i32_0 = arith.constant 0 : i32
    %c0_i32_1 = arith.constant 0 : i32
    return %c0_i32, %c0_i32_0 : i32, i32
  }
  func.func @transform_7(%arg0: i32) -> (i32, i32) {
    %c0_i32 = arith.constant 0 : i32
    %c0_i32_0 = arith.constant 0 : i32
    %c0_i32_1 = arith.constant 0 : i32
    return %c0_i32, %c0_i32_0 : i32, i32
  }
  func.func @transform_8(%arg0: i32) -> (i32, i32) {
    %c0_i32 = arith.constant 0 : i32
    %c0_i32_0 = arith.constant 0 : i32
    %c0_i32_1 = arith.constant 0 : i32
    return %c0_i32, %c0_i32_0 : i32, i32
  }
  func.func @transform_9(%arg0: i32) -> (i32, i32) {
    %c0_i32 = arith.constant 0 : i32
    %c0_i32_0 = arith.constant 0 : i32
    return %arg0, %c0_i32 : i32, i32
  }
}

</mosaic_0001>

<bundles_post_ra>
// kernel: tpu_custom_call.1
= control target key start
LH: loop header
LB: loop body
LE: loop exit
PB: predicated region body
PF: predicated region fallthrough
CT: control target
= control target key end

     0   :  { %s1286_s0 = inlined_call_operand.hbm [shape: f32[16,128], index: 0, kind: input, shape index: {}]   ;;  %s1287_s1 = inlined_call_operand.hbm [shape: f32[128,128], index: 1, kind: input, shape index: {}]   ;;  %s1288_s2 = inlined_call_operand.vmem [shape: f32[1,128], index: 2, kind: input, shape index: {}]   ;;  %s1289_s3 = inlined_call_operand.hbm [shape: f32[128,128], index: 3, kind: input, shape index: {}]   ;;  %s1290_s4 = inlined_call_operand.vmem [shape: f32[1,128], index: 4, kind: input, shape index: {}]   ;;  %s1291_s5 = inlined_call_operand.hbm [shape: f32[128,128], index: 5, kind: input, shape index: {}]   ;;  %s1292_s6 = inlined_call_operand.vmem [shape: f32[1,128], index: 6, kind: input, shape index: {}]   ;;  %s1293_s7 = inlined_call_operand.hbm [shape: f32[128,128], index: 7, kind: input, shape index: {}]   ;;  %s1294_s8 = inlined_call_operand.vmem [shape: f32[1,128], index: 8, kind: input, shape index: {}]   ;;  %s1295_s9 = inlined_call_operand.hbm [shape: f32[16,128], index: 9, kind: output, shape index: {}]  }
   0x1   :  { %1296 = sst [smem:[#allocation16_spill]] %s1287_s1 }
   0x2   :  { %1297 = sst [smem:[#allocation17_spill]] %s1289_s3 }
   0x3   :  { %1298 = sst [smem:[#allocation18_spill]] %s1291_s5 }
   0x4   :  { %1299 = sst [smem:[#allocation19_spill]] %s1293_s7 }
   0x5   :  { %14 = vsyncpa [#allocation3], 0 }
   0x6   :  { %16 = vsyncpa [#allocation3 + $0x1], 0 }
   0x7   :  { %17 = vsyncpa [#allocation6], 0 }
   0x8   :  { %18 = vsyncpa [#allocation9], 0 }
   0x9   :  { %19 = vsyncpa [#allocation4], 0 }
   0xa   :  { %21 = vsyncpa [#allocation4 + $0x1], 0  ;;  %s1100_s30 = smov 0   ;;  %s1102_s10 = smov 0  }
   0xb   :  { %s1104_s11 = smov 0   ;;  %s1106_s12 = smov 0  }
   0xc LB: > { %s1300_s1 = sld [smem:[#allocation16_spill]]  ;;  %s1124_s16 = sadd.s32 4294967295, %s1042_s12   ;;  %s1042_s12 = sphi %s1106_s12, %s1315_s12   ;;  %s1038_s11 = sphi %s1104_s11, %s1314_s11   ;;  %s1034_s10 = sphi %s1102_s10, %s1313_s10   ;;  %s1030_s30 = sphi %s1100_s30, %s1312_s30  }
   0xd   : > { %p706_p0 = scmp.ge.s32.totalorder %s1042_s12, 1  ;;  %p48_p1 = scmp.eq.s32.totalorder %s1124_s16, 0 }
   0xe   : > { %p252_p2 = scmp.lt.s32.totalorder %s1042_s12, 3  ;;  %s1044_s18 = smov [#allocation5]  }
   0xf   : > { %s265_s19 = sshll.u32 %s1044_s18, 4  ;;  %s1302_s5 = sld [smem:[#allocation18_spill]]  ;;  %s266_s19 = int_to_ptr.vmem [resolvable:$true] %s265_s19 }
  0x10   : > { %p1129_p3 = pnand %p706_p0, %p252_p2  ;;  %s1304_s3 = sld [smem:[#allocation17_spill]] }
  0x11   : > { %s1045_s27 = smov [#allocation8]   ;;  %s1046_s29 = smov 128  }
  0x12   : > { %s263_s15 = sshll.u32 %s1300_s1, 4  ;;  %p745_p4 = pneg %p1129_p3  ;;  %s264_s15 = int_to_ptr.hbm [resolvable:$true] %s263_s15 }
  0x13   : > { %s299_s28 = sshll.u32 %s1045_s27, 4  ;;  %s1047_s13 = smov 8   ;;  %s300_s28 = int_to_ptr.vmem [resolvable:$true] %s299_s28 }
  0x14   : > { %p1141_p6 = pnand %p745_p4, %p48_p1  ;;  %s1305_s7 = sld [smem:[#allocation19_spill]] }
  0x15   : > { %s297_s22 = sshll.u32 %s1302_s5, 4  ;;  %s1048_s21 = smov [#allocation7]   ;;  %s298_s22 = int_to_ptr.hbm [resolvable:$true] %s297_s22 }
  0x16   : > { %s280_s26 = sshll.u32 %s1304_s3, 4  ;;  %s282_s24 = sshll.u32 %s1048_s21, 4  ;;  %s281_s26 = int_to_ptr.hbm [resolvable:$true] %s280_s26  ;;  %s283_s24 = int_to_ptr.vmem [resolvable:$true] %s282_s24 }
  0x17   : > { %748 = dma.hbm_to_vmem [thread:$0]  (!%p1141_p6), %s264_s15, 2048, %s266_s19, [#allocation6], %s1046_s29, %s1046_s29, %s1047_s13  }
  0x18   : > { %754 = dma.hbm_to_vmem [thread:$0]  (!%p1141_p6), %s298_s22, 2048, %s300_s28, [#allocation9], %s1046_s29, %s1046_s29, %s1047_s13  }
  0x19   : > { %751 = dma.hbm_to_vmem [thread:$0]  (!%p1141_p6), %s281_s26, 2048, %s283_s24, [#allocation6], %s1046_s29, %s1046_s29, %s1047_s13  }
  0x1a   : > { %s314_s20 = sshll.u32 %s1305_s7, 4  ;;  %s1049_s15 = smov [#allocation10]   ;;  %s315_s20 = int_to_ptr.hbm [resolvable:$true] %s314_s20 }
  0x1b   : > { %s316_s19 = sshll.u32 %s1049_s15, 4  ;;  %s705_s22 = sadd.s32 4294967294, %s1042_s12   ;;  %s317_s19 = int_to_ptr.vmem [resolvable:$true] %s316_s19 }
  0x1c   : > { %757 = dma.hbm_to_vmem [thread:$0]  (!%p1141_p6), %s315_s20, 2048, %s317_s19, [#allocation9], %s1046_s29, %s1046_s29, %s1047_s13  }
  0x1d   : > { %s1161_s25 = sadd.s32 1, %s1042_s12   ;;  %s34_s28 = sadd.s32 1, %s1038_s11 }
  0x1e   : > { %s31_s27 = ssub.s32 %s1042_s12, %s1161_s25  ;;  %p41_p8 = scmp.ne.s32.totalorder %s1038_s11, %s1034_s10 }
  0x1f   : > { %p32_p7 = scmp.eq.s32.totalorder %s31_s27, 0  ;;  %p42_p9 = scmp.eq.s32.totalorder %s1042_s12, 0 }
  0x20   : > { %p47_p10 = scmp.ne.s32.totalorder %s1034_s10, %s1030_s30  ;;  %p239_p13 = scmp.eq.s32.totalorder %s1124_s16, 1 }
  0x21   : > { %s1172_s26 = scalar_select %p32_p7, %s1038_s11, %s34_s28  }
  0x22   : > { %p1174_p11 = por %p42_p9, %p41_p8  ;;  %p1180_p12 = por %p48_p1, %p47_p10 }
  0x23   : > { %p245_p0 = scmp.eq.s32.totalorder %s705_s22, 1  ;;  %p770_p2 = scmp.lt.s32.totalorder %s1042_s12, 2 }
  0x24   : > { %s333_s29 = sand.u32 1, %s1038_s11   ;;  %p1187_p4 = por %p239_p13, %p41_p8 }
  0x25   : > { %p1191_p6 = por %p245_p0, %p47_p10  ;;  %s712_s20 = sshll.u32 %s333_s29, 3 }
  0x26   : > { %s713_s21 = sshll.u32 %s1042_s12, 3  ;;  %s337_s27 = scalar_lea.vmem [#allocation2], %s712_s20 }
  0x27   : > { %s341_s19 = scalar_lea.hbm %s1286_s0, %s713_s21  ;;  %s345_s28 = sshll.u32 %s337_s27, 4  ;;  %s346_s28 = int_to_ptr.vmem [resolvable:$true] %s345_s28 }
  0x28   : > { %s343_s1 = sshll.u32 %s341_s19, 4  ;;  %p1201_p7 = pnand %p770_p2, %p1174_p11  ;;  %s344_s1 = int_to_ptr.hbm [resolvable:$true] %s343_s1 }
  0x29   : > { %s334_s3 = scalar_lea.sflag [#allocation3], %s333_s29  ;;  %s938_s5 = sshra.s32 %s344_s1, 4  ;;  %s939_s5 = int_to_ptr.hbm [resolvable:$true] %s938_s5 }
  0x2a   : > { %s940_s7 = scalar_lea.hbm %s939_s5, 8  ;;  %p942_p9 = pneg %p1201_p7 }
  0x2b   : > { %p941_p8 = scmp.ne.s32.totalorder %s939_s5, %s940_s7  ;;  %s945_s24 = scalar_lea.hbm %s1286_s0, 16 }
  0x2c   : > { %p946_p11 = scmp.lt.s32.totalorder %s939_s5, %s1286_s0  ;;  %p947_p0 = scmp.lt.s32.totalorder %s945_s24, %s940_s7 }
  0x2d   : > { %p943_p10 = pnand %p942_p9, %p941_p8 }
  0x2e   : > { %p948_p2 = por %p947_p0, %p946_p11 }
  0x2f   : > { %p944_p13 = pneg %p943_p10 }
  0x31   : > { %p949_p5 = pnand %p948_p2, %p944_p13 }
  0x33   : > { %952 = shalt.err (!%p949_p5)
}
  0x34   : > { %761 = dma.hbm_to_vmem [thread:$0]  (!%p1201_p7), %s344_s1, 128, %s346_s28, %s334_s3  }
  0x35   : > { %354 = sbr.rel (%p1129_p3) target bundleno = 628 (0x274), region = 56  ;;  %s1218_s29 = sand.u32 (!%p1129_p3), 1, %s1034_s10  }
  0x36   : > { %s715_s19 = sshll.u32 (!%p1129_p3), %s1218_s29, 3  ;;  %s357_s27 = scalar_lea.sflag (!%p1129_p3), [#allocation3], %s1218_s29 }
  0x37   : > { %s1224_s5 = scalar_lea.vmem (!%p1129_p3), [#allocation2], %s715_s19 }
  0x3a   : > { %1013 = dma.done.wait (%p1180_p12), %s357_s27, 128  }
  0x3b   : > { %1015 = vsyncadd (%p1180_p12), %s357_s27, 4294967168 }
  0x3c   : > { %1017 = dma.done.wait (%p48_p1), [#allocation6], 4096  }
  0x3d   : > { %1019 = vsyncadd (%p48_p1), [#allocation6], 4294963200 }
  0x3e   : > { %1021 = dma.done.wait (%p48_p1), [#allocation9], 4096  }
  0x3f   : > { %1023 = vsyncadd (%p48_p1), [#allocation9], 4294963200  ;;  %v432_v0 = vld [vmem:[#allocation5 + $0x78] sm:$0xff]  ;;  %v431_v1 = vld [vmem:[#allocation5 + $0x70] sm:$0xff]  ;;  %s722_s22 = sshll.u32 %s1124_s16, 3  ;;  %s415_s27 = scalar_lea.vmem [#allocation11], %s715_s19 }
  0x40   : > { %437 = vmatpush.msra.mxu0 %v432_v0  ;;  %v430_v2 = vld [vmem:[#allocation5 + $0x68] sm:$0xff]  ;;  %v429_v3 = vld [vmem:[#allocation5 + $0x60] sm:$0xff]  ;;  %v473_v4 = vld [vmem:[#allocation7 + $0x78] sm:$0xff]  ;;  %s592_s24 = scalar_lea.hbm %s1295_s9, %s722_s22  ;;  %s582_s3 = scalar_lea.sflag [#allocation4], %s1218_s29 }
  0x41   : > { %v428_v5 = vld [vmem:[#allocation5 + $0x58] sm:$0xff]  ;;  %478 = vmatpush.msra.mxu1 %v473_v4  ;;  %v472_v6 = vld [vmem:[#allocation7 + $0x70] sm:$0xff]  ;;  %v471_v7 = vld [vmem:[#allocation7 + $0x68] sm:$0xff]  ;;  %s596_s1 = sshll.u32 %s592_s24, 4  ;;  %s988_s28 = scalar_lea.hbm %s1295_s9, 16  ;;  %s597_s1 = int_to_ptr.hbm [resolvable:$true] %s596_s1 }
  0x42   : > { %438 = vmatpush.msra.mxu0 %v431_v1  ;;  %v427_v8 = vld [vmem:[#allocation5 + $0x50] sm:$0xff]  ;;  %v470_v9 = vld [vmem:[#allocation7 + $0x60] sm:$0xff]  ;;  %v426_v10 = vld [vmem:[#allocation5 + $0x48] sm:$0xff]  ;;  %s982_s16 = sshra.s32 %s597_s1, 4  ;;  %s983_s16 = int_to_ptr.hbm [resolvable:$true] %s982_s16 }
  0x43   : > { %479 = vmatpush.msra.mxu1 %v472_v6  ;;  %v469_v11 = vld [vmem:[#allocation7 + $0x58] sm:$0xff]  ;;  %v425_v12 = vld [vmem:[#allocation5 + $0x40] sm:$0xff]  ;;  %v468_v13 = vld [vmem:[#allocation7 + $0x50] sm:$0xff]  ;;  %s984_s7 = scalar_lea.hbm %s983_s16, 8  ;;  %p989_p12 = scmp.lt.s32.totalorder %s983_s16, %s1295_s9 }
  0x44   : > { %439 = vmatpush.msra.mxu0 %v430_v2  ;;  %v424_v14 = vld [vmem:[#allocation5 + $0x38] sm:$0xff]  ;;  %v467_v15 = vld [vmem:[#allocation7 + $0x48] sm:$0xff]  ;;  %v423_v16 = vld [vmem:[#allocation5 + $0x30] sm:$0xff]  ;;  %p985_p1 = scmp.ne.s32.totalorder %s983_s16, %s984_s7  ;;  %p990_p7 = scmp.lt.s32.totalorder %s988_s28, %s984_s7 }
  0x45   : > { %480 = vmatpush.msra.mxu1 %v471_v7  ;;  %v466_v17 = vld [vmem:[#allocation7 + $0x40] sm:$0xff]  ;;  %v422_v18 = vld [vmem:[#allocation5 + $0x28] sm:$0xff]  ;;  %v465_v19 = vld [vmem:[#allocation7 + $0x38] sm:$0xff] }
  0x46   : > { %440 = vmatpush.msra.mxu0 %v429_v3  ;;  %v421_v20 = vld [vmem:[#allocation5 + $0x20] sm:$0xff]  ;;  %v464_v21 = vld [vmem:[#allocation7 + $0x30] sm:$0xff]  ;;  %v420_v22 = vld [vmem:[#allocation5 + $0x18] sm:$0xff]  ;;  %p986_p3 = pnand %p985_p1, %p1187_p4  ;;  %p991_p8 = por %p990_p7, %p989_p12 }
  0x47   : > { %481 = vmatpush.msra.mxu1 %v470_v9  ;;  %v463_v23 = vld [vmem:[#allocation7 + $0x28] sm:$0xff]  ;;  %v419_v24 = vld [vmem:[#allocation5 + $0x10] sm:$0xff]  ;;  %v462_v25 = vld [vmem:[#allocation7 + $0x20] sm:$0xff] }
  0x48   : > { %441 = vmatpush.msra.mxu0 %v428_v5  ;;  %v418_v26 = vld [vmem:[#allocation5 + $0x8] sm:$0xff]  ;;  %v461_v27 = vld [vmem:[#allocation7 + $0x18] sm:$0xff]  ;;  %v417_v28 = vld [vmem:[#allocation5] sm:$0xff]  ;;  %p987_p5 = pneg %p986_p3 }
  0x49   : > { %482 = vmatpush.msra.mxu1 %v469_v11  ;;  %v416_v29 = vld [vmem:[%s1224_s5] sm:$0xff]  ;;  %v459_v31 = vld [vmem:[#allocation7 + $0x8] sm:$0xff]  ;;  %v458_v32 = vld [vmem:[#allocation7] sm:$0xff]  ;;  %s594_s5 = sshll.u32 %s415_s27, 4  ;;  %s595_s5 = int_to_ptr.vmem [resolvable:$true] %s594_s5 }
  0x4a   : > { %442 = vmatpush.msra.mxu0 %v427_v8  ;;  %v460_v30 = vld [vmem:[#allocation7 + $0x10] sm:$0xff]  ;;  %v514_v33 = vld [vmem:[#allocation8 + $0x78] sm:$0xff]  ;;  %v512_v35 = vld [vmem:[#allocation8 + $0x68] sm:$0xff]  ;;  %p992_p9 = pnand %p991_p8, %p987_p5 }
  0x4b   : > { %483 = vmatpush.msra.mxu1 %v468_v13  ;;  %v513_v34 = vld [vmem:[#allocation8 + $0x70] sm:$0xff]  ;;  %519 = vmatpush.msra.mxu2 %v514_v33  ;;  %v511_v36 = vld [vmem:[#allocation8 + $0x60] sm:$0xff]  ;;  %v510_v37 = vld [vmem:[#allocation8 + $0x58] sm:$0xff] }
  0x4c   : > { %443 = vmatpush.msra.mxu0 %v426_v10  ;;  %v509_v38 = vld [vmem:[#allocation8 + $0x50] sm:$0xff]  ;;  %v508_v39 = vld [vmem:[#allocation8 + $0x48] sm:$0xff]  ;;  %v507_v40 = vld [vmem:[#allocation8 + $0x40] sm:$0xff] }
  0x4d   : > { %484 = vmatpush.msra.mxu1 %v467_v15  ;;  %520 = vmatpush.msra.mxu2 %v513_v34  ;;  %v506_v41 = vld [vmem:[#allocation8 + $0x38] sm:$0xff]  ;;  %v505_v42 = vld [vmem:[#allocation8 + $0x30] sm:$0xff]  ;;  %v504_v43 = vld [vmem:[#allocation8 + $0x28] sm:$0xff] }
  0x4e   : > { %444 = vmatpush.msra.mxu0 %v425_v12  ;;  %v503_v44 = vld [vmem:[#allocation8 + $0x20] sm:$0xff]  ;;  %v502_v45 = vld [vmem:[#allocation8 + $0x18] sm:$0xff]  ;;  %v814_v46 = vld [vmem:[%s1288_s2] ss:$0 sm:$0xff] }
  0x4f   : > { %485 = vmatpush.msra.mxu1 %v466_v17  ;;  %521 = vmatpush.msra.mxu2 %v512_v35  ;;  %v501_v50 = vld [vmem:[#allocation8 + $0x10] sm:$0xff]  ;;  %v500_v51 = vld [vmem:[#allocation8 + $0x8] sm:$0xff]  ;;  %v499_v52 = vld [vmem:[#allocation8] sm:$0xff] }
  0x50   : > { %445 = vmatpush.msra.mxu0 %v424_v14  ;;  %v555_v53 = vld [vmem:[#allocation10 + $0x78] sm:$0xff]  ;;  %v554_v54 = vld [vmem:[#allocation10 + $0x70] sm:$0xff]  ;;  %v553_v55 = vld [vmem:[#allocation10 + $0x68] sm:$0xff] }
  0x51   : > { %486 = vmatpush.msra.mxu1 %v465_v19  ;;  %522 = vmatpush.msra.mxu2 %v511_v36  ;;  %v552_v56 = vld [vmem:[#allocation10 + $0x60] sm:$0xff]  ;;  %v551_v57 = vld [vmem:[#allocation10 + $0x58] sm:$0xff]  ;;  %v550_v58 = vld [vmem:[#allocation10 + $0x50] sm:$0xff] }
  0x52   : > { %446 = vmatpush.msra.mxu0 %v423_v16  ;;  %560 = vmatpush.msra.mxu3 %v555_v53  ;;  %v549_v59 = vld [vmem:[#allocation10 + $0x48] sm:$0xff]  ;;  %v548_v60 = vld [vmem:[#allocation10 + $0x40] sm:$0xff]  ;;  %v547_v61 = vld [vmem:[#allocation10 + $0x38] sm:$0xff] }
  0x53   : > { %487 = vmatpush.msra.mxu1 %v464_v21  ;;  %523 = vmatpush.msra.mxu2 %v510_v37  ;;  %v546_v62 = vld [vmem:[#allocation10 + $0x30] sm:$0xff]  ;;  %v545_v63 = vld [vmem:[#allocation10 + $0x28] sm:$0xff]  ;;  %v544_v0 = vld [vmem:[#allocation10 + $0x20] sm:$0xff] }
  0x54   : > { %447 = vmatpush.msra.mxu0 %v422_v18  ;;  %561 = vmatpush.msra.mxu3 %v554_v54  ;;  %v543_v1 = vld [vmem:[#allocation10 + $0x18] sm:$0xff]  ;;  %v815_v2 = vld [vmem:[%s1290_s4] ss:$0 sm:$0xff]  ;;  %v541_v7 = vld [vmem:[#allocation10 + $0x8] sm:$0xff] }
  0x55   : > { %488 = vmatpush.msra.mxu1 %v463_v23  ;;  %524 = vmatpush.msra.mxu2 %v509_v38  ;;  %v542_v6 = vld [vmem:[#allocation10 + $0x10] sm:$0xff]  ;;  %v540_v8 = vld [vmem:[#allocation10] sm:$0xff] }
  0x56   : > { %448 = vmatpush.msra.mxu0 %v421_v20  ;;  %562 = vmatpush.msra.mxu3 %v553_v55  ;;  %v816_v9 = vld [vmem:[%s1292_s6] ss:$0 sm:$0xff] }
  0x57   : > { %489 = vmatpush.msra.mxu1 %v462_v25  ;;  %525 = vmatpush.msra.mxu2 %v508_v39  ;;  %v817_v13 = vld [vmem:[%s1294_s8] ss:$0 sm:$0xff] }
  0x58   : > { %449 = vmatpush.msra.mxu0 %v420_v22  ;;  %563 = vmatpush.msra.mxu3 %v552_v56 }
  0x59   : > { %490 = vmatpush.msra.mxu1 %v461_v27  ;;  %526 = vmatpush.msra.mxu2 %v507_v40 }
  0x5a   : > { %450 = vmatpush.msra.mxu0 %v419_v24  ;;  %564 = vmatpush.msra.mxu3 %v551_v57 }
  0x5b   : > { %491 = vmatpush.msra.mxu1 %v460_v30  ;;  %527 = vmatpush.msra.mxu2 %v506_v41 }
  0x5c   : > { %451 = vmatpush.msra.mxu0 %v418_v26  ;;  %565 = vmatpush.msra.mxu3 %v550_v58 }
  0x5d   : > { %492 = vmatpush.msra.mxu1 %v459_v31  ;;  %528 = vmatpush.msra.mxu2 %v505_v42 }
  0x5e   : > { %452 = vmatpush.msra.mxu0 %v417_v28  ;;  %566 = vmatpush.msra.mxu3 %v549_v59 }
  0x5f   : > { %453 = vmatmul.f32.vlgmr.msra.gmra.mxu0 %v416_v29  ;;  %493 = vmatpush.msra.mxu1 %v458_v32 }
  0x60   : > { %529 = vmatpush.msra.mxu2 %v504_v43  ;;  %567 = vmatpush.msra.mxu3 %v548_v60 }
  0x62   : > { %530 = vmatpush.msra.mxu2 %v503_v44  ;;  %568 = vmatpush.msra.mxu3 %v547_v61 }
  0x64   : > { %531 = vmatpush.msra.mxu2 %v502_v45  ;;  %569 = vmatpush.msra.mxu3 %v546_v62 }
  0x66   : > { %532 = vmatpush.msra.mxu2 %v501_v50  ;;  %570 = vmatpush.msra.mxu3 %v545_v63 }
  0x68   : > { %533 = vmatpush.msra.mxu2 %v500_v51  ;;  %571 = vmatpush.msra.mxu3 %v544_v0 }
  0x6a   : > { %534 = vmatpush.msra.mxu2 %v499_v52  ;;  %572 = vmatpush.msra.mxu3 %v543_v1 }
  0x6c   : > { %573 = vmatpush.msra.mxu3 %v542_v6 }
  0x6e   : > { %574 = vmatpush.msra.mxu3 %v541_v7 }
  0x70   : > { %575 = vmatpush.msra.mxu3 %v540_v8 }
  0xdc   : > { %v454_v47 = vpop.f32.mrf.mxu0 }
  0xdd   : > { %v455_v48 = vadd.f32 %v814_v46, %v454_v47 }
  0xdf   : > { %v457_v49 = vmax.f32 %v455_v48, 0.0 }
  0xe1   : > { %494 = vmatmul.f32.vlgmr.msra.gmra.mxu1 %v457_v49 }
 0x15e   : > { %v495_v3 = vpop.f32.mrf.mxu1 }
 0x15f   : > { %v496_v4 = vadd.f32 %v815_v2, %v495_v3 }
 0x161   : > { %v498_v5 = vmax.f32 %v496_v4, 0.0 }
 0x163   : > { %535 = vmatmul.f32.vlgmr.msra.gmra.mxu2 %v498_v5 }
 0x1e6   : > { %v536_v10 = vpop.f32.mrf.mxu2 }
 0x1e7   : > { %v537_v11 = vadd.f32 %v816_v9, %v536_v10 }
 0x1e9   : > { %v539_v12 = vmax.f32 %v537_v11, 0.0 }
 0x1eb   : > { %576 = vmatmul.f32.vlgmr.msra.gmra.mxu3 %v539_v12 }
 0x26e   : > { %v577_v14 = vpop.f32.mrf.mxu3 }
 0x26f   : > { %v578_v15 = vadd.f32 %v817_v13, %v577_v14 }
 0x271   : > { %580 = vst [vmem:[%s415_s27] sm:$0xff] %v578_v15 }
 0x272   : > { %995 = shalt.err (!%p992_p9)
}
 0x273   : > { %743 = dma.vmem_to_hbm [thread:$0]  (%p1187_p4), %s595_s5, 128, %s597_s1, %s582_s3  }
 0x274 PF: > { %s608_s29 = sand.u32 1, %s1030_s30   ;;  %p1311_p10 = scmp.ge.s32.totalorder %s1042_s12, 2 }
 0x275   : > { %s609_s20 = scalar_lea.sflag [#allocation4], %s608_s29 }
 0x276   : > { %p763_p13 = pnand %p1311_p10, %p1191_p6 }
 0x278   : > { %p764_p11 = pneg %p763_p13 }
 0x27a   : > { %1025 = dma.done.wait (%p764_p11), %s609_s20, 128  }
 0x27b   : > { %1027 = vsyncadd (%p764_p11), %s609_s20, 4294967168  ;;  %p24_p0 = scmp.ge.s32.totalorder %s1161_s25, 4   ;;  %s1312_s30 = smov %s1034_s10 }
 0x27c   : > { %s1313_s10 = smov %s1038_s11  ;;  %s1314_s11 = smov %s1172_s26 }
 0x27d   : > { %s1315_s12 = smov %s1161_s25  ;;  %26 = sbr.rel (!%p24_p0) target bundleno = 12 (0xc), region = 117 }
 0x282   :  { %615 = vsyncpa [#allocation3], 1 }
 0x283   :  { %617 = vsyncpa [#allocation3 + $0x1], 1 }
 0x284   :  { %618 = vsyncpa [#allocation6], 1 }
 0x285   :  { %619 = vsyncpa [#allocation9], 1 }
 0x286   :  { %620 = vsyncpa [#allocation4], 1 }
 0x287   :  { %622 = vsyncpa [#allocation4 + $0x1], 1 }

</bundles_post_ra>
